<compile_context>
chip_gen: v7x
topology: tpu7x:2x2x1
jax: 0.10.0
libtpu: 0.0.40
codegen_flags: <defaults>
</compile_context>

<pallas_src>
from functools import partial

import jax
import jax.numpy as jnp
import numpy as np
from jax.experimental import pallas as pl
from jax.experimental.pallas import tpu as pltpu

N_PAD = 128  # lane-dense width for the final (padded) logits store


# ----------------------------------------------------------------------------
# Fused kernel: conv3x3(+bias, as im2col matmul)+ReLU -> flatten -> FC1+ReLU
# -> FC2 (lane-dense padded output).  One verification instance per grid step;
# everything stays in VMEM.
# ----------------------------------------------------------------------------
def _fused_forward_kernel(patches_ref, convw_ref, fc1w_ref, fc1mask_ref,
                          fc1b_ref, fc2w_ref, fc2b_ref, o_ref,
                          *, hidden, nh):
    """
    patches_ref: (K_PAD, H*W)      im2col patches; row 9*Cin is all-ones (bias
                                   row), remaining rows zero-padded to K_PAD
    convw_ref:   (Cout, K_PAD)     conv weight matrix with bias folded in
    fc1w_ref:    (H*W, Cout*Hid)   lane-dense FC1 weight:
                                   fc1w[s, c*Hid + n] = W1[n, c*H*W + s]
    fc1mask_ref: (Cout, Cout*Hid)  block-diagonal 0/1 mask
    fc1b_ref:    (1, Cout*Hid)     FC1 bias in the first Hid lanes, 0 elsewhere
    fc2w_ref:    (Cout*Hid, N_PAD) FC2 weight; nonzero only in [:Hid, :n_cls]
    fc2b_ref:    (1, N_PAD)
    o_ref:       (1, N_PAD)
    """
    # --- Conv2d 3x3 + bias (folded) as ONE im2col matmul, then ReLU ---
    conv = jnp.dot(convw_ref[...], patches_ref[...],
                   preferred_element_type=jnp.float32)            # (Cout, H*W)
    conv = jnp.maximum(conv, 0.0)

    # --- Flatten + FC1 as ONE dense matmul (no serialized per-channel loop) ---
    p = jnp.dot(conv, fc1w_ref[...],
                preferred_element_type=jnp.float32)               # (Cout, Cout*Hid)
    pm = p * fc1mask_ref[...]          # keep only the c'==c diagonal blocks

    # Collapse the Cout lane-blocks of width Hid into the first Hid lanes with
    # log2(Cout) XLU rotations, then a sublane sum (rolls/sum commute).
    shift = nh // 2
    while shift >= hidden:
        pm = pm + pltpu.roll(pm, shift=shift, axis=1)
        shift //= 2
    v = jnp.sum(pm, axis=0, keepdims=True)                        # (1, Cout*Hid)

    # ReLU(FC1); lanes >= Hid are dead (corresponding FC2 rows are zero).
    h1 = jnp.maximum(v + fc1b_ref[...], 0.0)

    # --- FC2 into a lane-dense padded output ---
    y = jnp.dot(h1, fc2w_ref[...], preferred_element_type=jnp.float32)
    o_ref[...] = (y + fc2b_ref[...]).astype(o_ref.dtype)          # (1, N_PAD)


# ----------------------------------------------------------------------------
# Jitted forward over N independent instances: im2col plumbing (XLA) + one
# gridded pallas_call (weights VMEM-resident, per-instance I/O double-buffered).
# ----------------------------------------------------------------------------
def _build_forward(c_in, c_out, h, w, hidden, n_cls, k_pad):
    hw = h * w
    nh = c_out * hidden
    k_im2col = 9 * c_in
    kernel = partial(_fused_forward_kernel, hidden=hidden, nh=nh)

    def forward(params, x):
        # x: (N, C, H, W); each leading-dim entry is an independent batch-1
        # evaluation of the same realized graph.
        n = x.shape[0]
        xpad = jnp.pad(x, ((0, 0), (0, 0), (1, 1), (1, 1)))       # (N,C,H+2,W+2)
        taps = [xpad[:, :, dy:dy + h, dx:dx + w].reshape(n, c_in, hw)
                for dy in range(3) for dx in range(3)]
        patches = jnp.concatenate(
            taps + [jnp.ones((n, 1, hw), x.dtype),                 # bias row
                    jnp.zeros((n, k_pad - k_im2col - 1, hw), x.dtype)],
            axis=1)                                                # (N,K_PAD,HW)

        grid_spec = pltpu.PrefetchScalarGridSpec(
            num_scalar_prefetch=0,
            grid=(n,),
            in_specs=[
                # per-instance input (double-buffered along the grid)
                pl.BlockSpec((None, k_pad, hw), lambda i: (i, 0, 0)),
                # weights: constant block index -> DMA'd once, stay resident
                pl.BlockSpec((c_out, k_pad), lambda i: (0, 0)),
                pl.BlockSpec((hw, nh), lambda i: (0, 0)),
                pl.BlockSpec((c_out, nh), lambda i: (0, 0)),
                pl.BlockSpec((1, nh), lambda i: (0, 0)),
                pl.BlockSpec((nh, N_PAD), lambda i: (0, 0)),
                pl.BlockSpec((1, N_PAD), lambda i: (0, 0)),
            ],
            out_specs=pl.BlockSpec((None, 1, N_PAD), lambda i: (i, 0, 0)),
        )
        out_pad = pl.pallas_call(
            kernel,
            out_shape=jax.ShapeDtypeStruct((n, 1, N_PAD), jnp.float32),
            grid_spec=grid_spec,
            compiler_params=pltpu.CompilerParams(
                dimension_semantics=("parallel",)),
        )(patches,
          params["conv_w_aug"], params["fc1_w_dense"], params["fc1_mask"],
          params["fc1_b_pad"], params["fc2_w_pad"], params["fc2_b_pad"])
        return out_pad.reshape(n, N_PAD)[:, :n_cls]                # (N, n_cls)

    return jax.jit(forward)


# ----------------------------------------------------------------------------
# Model wrapper (mirrors ConvertModel.forward on the realized graph)
# ----------------------------------------------------------------------------
class ConvertModelPallas:
    def __init__(self, key, c_in=4, c_out=8, h=16, w=16, hidden=32, n_cls=10):
        assert c_out & (c_out - 1) == 0 and hidden & (hidden - 1) == 0
        assert n_cls <= N_PAD
        self.c_in, self.c_out, self.h, self.w = c_in, c_out, h, w
        self.hidden, self.n_cls = hidden, n_cls
        hw = h * w
        nh = c_out * hidden
        k_im2col = 9 * c_in
        k_pad = ((k_im2col + 1 + 7) // 8) * 8                      # bias row + pad to mult. of 8

        k1, k2, k3, k4, k5, k6 = jax.random.split(key, 6)
        # Torch-layout parameters (the "onnx initializers").
        self.conv_w = jax.random.normal(k1, (c_out, c_in, 3, 3), jnp.float32) * 0.1
        self.conv_b = jax.random.normal(k2, (c_out,), jnp.float32) * 0.1
        self.fc1_w = jax.random.normal(k3, (hidden, c_out * hw), jnp.float32) * 0.05
        self.fc1_b = jax.random.normal(k4, (hidden,), jnp.float32) * 0.1
        self.fc2_w = jax.random.normal(k5, (n_cls, hidden), jnp.float32) * 0.1
        self.fc2_b = jax.random.normal(k6, (n_cls,), jnp.float32) * 0.1

        # --- Precomputed kernel layouts (hoisted out of the forward pass) ---
        # conv weight as im2col matrix with the bias folded in as a column.
        conv_w_mat = jnp.transpose(self.conv_w, (0, 2, 3, 1)).reshape(c_out, k_im2col)
        conv_w_aug = jnp.zeros((c_out, k_pad), jnp.float32)
        conv_w_aug = conv_w_aug.at[:, :k_im2col].set(conv_w_mat)
        conv_w_aug = conv_w_aug.at[:, k_im2col].set(self.conv_b)
        # FC1 weight lane-dense: fc1_w_dense[s, c*Hid + n] = fc1_w[n, c*HW + s].
        fc1_w_dense = jnp.transpose(
            self.fc1_w.reshape(hidden, c_out, hw), (2, 1, 0)).reshape(hw, nh)
        # Block-diagonal mask selecting P[c, c*Hid + n].
        fc1_mask = (jnp.arange(nh)[None, :] // hidden
                    == jnp.arange(c_out)[:, None]).astype(jnp.float32)
        fc1_b_pad = jnp.zeros((1, nh), jnp.float32).at[0, :hidden].set(self.fc1_b)
        # FC2 weight/bias zero-padded to lane-dense N_PAD output columns;
        # rows >= hidden are zero so the dead FC1 lanes contribute nothing.
        fc2_w_pad = jnp.zeros((nh, N_PAD), jnp.float32).at[:hidden, :n_cls].set(self.fc2_w.T)
        fc2_b_pad = jnp.zeros((1, N_PAD), jnp.float32).at[0, :n_cls].set(self.fc2_b)

        self.params = {
            "conv_w_aug": conv_w_aug,
            "fc1_w_dense": fc1_w_dense,
            "fc1_mask": fc1_mask,
            "fc1_b_pad": fc1_b_pad,
            "fc2_w_pad": fc2_w_pad,
            "fc2_b_pad": fc2_b_pad,
        }
        self._jit_forward = _build_forward(c_in, c_out, h, w, hidden, n_cls, k_pad)

    def __call__(self, x):
        # ConvertModel (non-experimental) restriction: batch size must be 1.
        assert x.shape[0] == 1, "batch size > 1 not supported (non-experimental)"
        return self._jit_forward(self.params, x)

    def forward_instances(self, xs):
        # Many independent batch-1 instances through the same graph
        # (equivalent to N sequential __call__'s), amortized over one grid.
        return self._jit_forward(self.params, xs)

    # Pure-JAX reference (same math, no Pallas) for correctness checking.
    def reference(self, x):
        y = jax.lax.conv_general_dilated(
            x, self.conv_w, window_strides=(1, 1), padding="SAME",
            dimension_numbers=("NCHW", "OIHW", "NCHW"))
        y = jnp.maximum(y + self.conv_b[None, :, None, None], 0.0)
        y = y.reshape(1, -1)
        y = jnp.maximum(y @ self.fc1_w.T + self.fc1_b[None, :], 0.0)
        return y @ self.fc2_w.T + self.fc2_b[None, :]


# TODO(synk): ConvertModel's dynamic ONNX-graph dispatch (Loop nodes, pruning
# bookkeeping, activation GC) is Python control flow with no Pallas equivalent;
# only the fixed realized graph above is compiled.

if __name__ == "__main__":
    root = jax.random.PRNGKey(0)
    key_model, key_x1, key_xs = jax.random.split(root, 3)
    model = ConvertModelPallas(key_model)

    # Single instance (ConvertModel's non-experimental batch==1 path).
    x1 = jax.random.normal(key_x1, (1, 4, 16, 16), jnp.float32)
    out1 = jax.block_until_ready(model(x1))
    ref1 = jax.block_until_ready(model.reference(x1))
    if not np.allclose(np.asarray(out1), np.asarray(ref1), rtol=1e-4, atol=1e-4):
        raise AssertionError("Pallas output (batch=1) does not match reference")

    # Multiple independent instances through the same net (gridded path).
    xs = jax.random.normal(key_xs, (2, 4, 16, 16), jnp.float32)
    outs = jax.block_until_ready(model.forward_instances(xs))
    refs = jnp.concatenate([model.reference(xs[i:i + 1]) for i in range(xs.shape[0])], axis=0)
    if not np.allclose(np.asarray(outs), np.asarray(refs), rtol=1e-4, atol=1e-4):
        raise AssertionError("Pallas output (instances=2) does not match reference")

    print("KERNEL_OK")
</pallas_src>

<mosaic_0001>
module attributes {stable_mosaic.version = 11 : i64} {
  func.func @_fused_forward_kernel(%arg0: i32, %arg1: memref<1x40x256xf32, #tpu.memory_space<vmem>>, %arg2: memref<8x40xf32, #tpu.memory_space<vmem>>, %arg3: memref<256x256xf32, #tpu.memory_space<vmem>>, %arg4: memref<8x256xf32, #tpu.memory_space<vmem>>, %arg5: memref<1x256xf32, #tpu.memory_space<vmem>>, %arg6: memref<256x128xf32, #tpu.memory_space<vmem>>, %arg7: memref<1x128xf32, #tpu.memory_space<vmem>>, %arg8: memref<1x1x128xf32, #tpu.memory_space<vmem>>) attributes {dimension_semantics = [#tpu.dimension_semantics<parallel>], iteration_bounds = array<i64: 1>, scalar_prefetch = 0 : i64, scratch_operands = 0 : i64, tpu.core_type = #tpu.core_type<tc>, window_params = [{transform_indices = @transform_0, window_bounds = array<i64: 1, 40, 256>}, {pipeline_mode = #tpu.pipeline_mode<synchronous>, transform_indices = @transform_1, window_bounds = array<i64: 8, 40>}, {pipeline_mode = #tpu.pipeline_mode<synchronous>, transform_indices = @transform_2, window_bounds = array<i64: 256, 256>}, {pipeline_mode = #tpu.pipeline_mode<synchronous>, transform_indices = @transform_3, window_bounds = array<i64: 8, 256>}, {pipeline_mode = #tpu.pipeline_mode<synchronous>, transform_indices = @transform_4, window_bounds = array<i64: 1, 256>}, {pipeline_mode = #tpu.pipeline_mode<synchronous>, transform_indices = @transform_5, window_bounds = array<i64: 256, 128>}, {pipeline_mode = #tpu.pipeline_mode<synchronous>, transform_indices = @transform_6, window_bounds = array<i64: 1, 128>}, {transform_indices = @transform_7, window_bounds = array<i64: 1, 1, 128>}]} {
    %c0 = arith.constant 0 : index
    %c0_0 = arith.constant 0 : index
    %0 = vector.load %arg2[%c0, %c0_0] : memref<8x40xf32, #tpu.memory_space<vmem>>, vector<8x40xf32>
    %c0_1 = arith.constant 0 : index
    %c0_2 = arith.constant 0 : index
    %c0_3 = arith.constant 0 : index
    %1 = vector.load %arg1[%c0_1, %c0_2, %c0_3] : memref<1x40x256xf32, #tpu.memory_space<vmem>>, vector<1x40x256xf32>
    %2 = vector.shape_cast %1 : vector<1x40x256xf32> to vector<40x256xf32>
    %cst = arith.constant dense<0.000000e+00> : vector<8x256xf32>
    %3 = tpu.matmul %0, %2, %cst {dimension_numbers = #tpu.dot_dimension_numbers<[1], [0], [0], [1], [0, 0, 1, 1], [], []>} : vector<8x40xf32>, vector<40x256xf32>, vector<8x256xf32> -> vector<8x256xf32>
    %cst_4 = arith.constant 0.000000e+00 : f32
    %4 = vector.broadcast %cst_4 : f32 to vector<8x256xf32>
    %5 = arith.maximumf %3, %4 : vector<8x256xf32>
    %c0_5 = arith.constant 0 : index
    %c0_6 = arith.constant 0 : index
    %6 = vector.load %arg3[%c0_5, %c0_6] : memref<256x256xf32, #tpu.memory_space<vmem>>, vector<256x256xf32>
    %cst_7 = arith.constant dense<0.000000e+00> : vector<8x256xf32>
    %7 = tpu.matmul %5, %6, %cst_7 {dimension_numbers = #tpu.dot_dimension_numbers<[1], [0], [0], [1], [0, 0, 1, 1], [], []>} : vector<8x256xf32>, vector<256x256xf32>, vector<8x256xf32> -> vector<8x256xf32>
    %c0_8 = arith.constant 0 : index
    %c0_9 = arith.constant 0 : index
    %8 = vector.load %arg4[%c0_8, %c0_9] : memref<8x256xf32, #tpu.memory_space<vmem>>, vector<8x256xf32>
    %9 = arith.mulf %7, %8 : vector<8x256xf32>
    %c128_i32 = arith.constant 128 : i32
    %10 = tpu.dynamic_rotate %9 by %c128_i32 dim 1 : vector<8x256xf32>, i32 -> vector<8x256xf32>
    %11 = arith.addf %9, %10 : vector<8x256xf32>
    %c64_i32 = arith.constant 64 : i32
    %12 = tpu.dynamic_rotate %11 by %c64_i32 dim 1 : vector<8x256xf32>, i32 -> vector<8x256xf32>
    %13 = arith.addf %11, %12 : vector<8x256xf32>
    %c32_i32 = arith.constant 32 : i32
    %14 = tpu.dynamic_rotate %13 by %c32_i32 dim 1 : vector<8x256xf32>, i32 -> vector<8x256xf32>
    %15 = arith.addf %13, %14 : vector<8x256xf32>
    %cst_10 = arith.constant dense<0.000000e+00> : vector<256xf32>
    %16 = vector.multi_reduction <add>, %15, %cst_10 [0] : vector<8x256xf32> to vector<256xf32>
    %17 = vector.shape_cast %16 : vector<256xf32> to vector<1x256xf32>
    %c0_11 = arith.constant 0 : index
    %c0_12 = arith.constant 0 : index
    %18 = vector.load %arg5[%c0_11, %c0_12] : memref<1x256xf32, #tpu.memory_space<vmem>>, vector<1x256xf32>
    %19 = arith.addf %17, %18 : vector<1x256xf32>
    %cst_13 = arith.constant 0.000000e+00 : f32
    %20 = vector.broadcast %cst_13 : f32 to vector<1x256xf32>
    %21 = arith.maximumf %19, %20 : vector<1x256xf32>
    %c0_14 = arith.constant 0 : index
    %c0_15 = arith.constant 0 : index
    %22 = vector.load %arg6[%c0_14, %c0_15] : memref<256x128xf32, #tpu.memory_space<vmem>>, vector<256x128xf32>
    %cst_16 = arith.constant dense<0.000000e+00> : vector<1x128xf32>
    %23 = tpu.matmul %21, %22, %cst_16 {dimension_numbers = #tpu.dot_dimension_numbers<[1], [0], [0], [1], [0, 0, 1, 1], [], []>} : vector<1x256xf32>, vector<256x128xf32>, vector<1x128xf32> -> vector<1x128xf32>
    %c0_17 = arith.constant 0 : index
    %c0_18 = arith.constant 0 : index
    %24 = vector.load %arg7[%c0_17, %c0_18] : memref<1x128xf32, #tpu.memory_space<vmem>>, vector<1x128xf32>
    %25 = arith.addf %23, %24 : vector<1x128xf32>
    %c0_19 = arith.constant 0 : index
    %c0_20 = arith.constant 0 : index
    %c0_21 = arith.constant 0 : index
    %26 = vector.load %arg8[%c0_19, %c0_20, %c0_21] : memref<1x1x128xf32, #tpu.memory_space<vmem>>, vector<1x1x128xf32>
    %27 = vector.shape_cast %26 : vector<1x1x128xf32> to vector<1x128xf32>
    %28 = vector.shape_cast %25 : vector<1x128xf32> to vector<1x1x128xf32>
    tpu.vector_store %arg8[%c0_19, %c0_20, %c0_21], %28 {strides = array<i32>} : memref<1x1x128xf32, #tpu.memory_space<vmem>>, vector<1x1x128xf32>,
    return
  }
  func.func @transform_0(%arg0: i32) -> (i32, i32, i32) {
    %c0_i32 = arith.constant 0 : i32
    %c0_i32_0 = arith.constant 0 : i32
    %c0_i32_1 = arith.constant 0 : i32
    return %arg0, %c0_i32, %c0_i32_0 : i32, i32, i32
  }
  func.func @transform_1(%arg0: i32) -> (i32, i32) {
    %c0_i32 = arith.constant 0 : i32
    %c0_i32_0 = arith.constant 0 : i32
    %c0_i32_1 = arith.constant 0 : i32
    return %c0_i32, %c0_i32_0 : i32, i32
  }
  func.func @transform_2(%arg0: i32) -> (i32, i32) {
    %c0_i32 = arith.constant 0 : i32
    %c0_i32_0 = arith.constant 0 : i32
    %c0_i32_1 = arith.constant 0 : i32
    return %c0_i32, %c0_i32_0 : i32, i32
  }
  func.func @transform_3(%arg0: i32) -> (i32, i32) {
    %c0_i32 = arith.constant 0 : i32
    %c0_i32_0 = arith.constant 0 : i32
    %c0_i32_1 = arith.constant 0 : i32
    return %c0_i32, %c0_i32_0 : i32, i32
  }
  func.func @transform_4(%arg0: i32) -> (i32, i32) {
    %c0_i32 = arith.constant 0 : i32
    %c0_i32_0 = arith.constant 0 : i32
    %c0_i32_1 = arith.constant 0 : i32
    return %c0_i32, %c0_i32_0 : i32, i32
  }
  func.func @transform_5(%arg0: i32) -> (i32, i32) {
    %c0_i32 = arith.constant 0 : i32
    %c0_i32_0 = arith.constant 0 : i32
    %c0_i32_1 = arith.constant 0 : i32
    return %c0_i32, %c0_i32_0 : i32, i32
  }
  func.func @transform_6(%arg0: i32) -> (i32, i32) {
    %c0_i32 = arith.constant 0 : i32
    %c0_i32_0 = arith.constant 0 : i32
    %c0_i32_1 = arith.constant 0 : i32
    return %c0_i32, %c0_i32_0 : i32, i32
  }
  func.func @transform_7(%arg0: i32) -> (i32, i32, i32) {
    %c0_i32 = arith.constant 0 : i32
    %c0_i32_0 = arith.constant 0 : i32
    %c0_i32_1 = arith.constant 0 : i32
    return %arg0, %c0_i32, %c0_i32_0 : i32, i32, i32
  }
}

</mosaic_0001>

<bundles_post_ra>
// kernel: forward.1
= control target key start
LH: loop header
LB: loop body
LE: loop exit
PB: predicated region body
PF: predicated region fallthrough
CT: control target
= control target key end

     0   :  { %v571_v7 = vmov 0.0   ;;  %vm38_vm0 = vcmask 326656   ;;  %s960_s0 = inlined_call_operand.vmem [shape: f32[1,40,256], index: 0, kind: input, shape index: {}]   ;;  %s961_s1 = inlined_call_operand.vmem [shape: f32[8,40], index: 1, kind: input, shape index: {}]   ;;  %s962_s2 = inlined_call_operand.vmem [shape: f32[256,256], index: 2, kind: input, shape index: {}]   ;;  %s963_s3 = inlined_call_operand.vmem [shape: f32[8,256], index: 3, kind: input, shape index: {}]   ;;  %s964_s4 = inlined_call_operand.vmem [shape: f32[1,256], index: 4, kind: input, shape index: {}]   ;;  %s965_s5 = inlined_call_operand.vmem [shape: f32[256,128], index: 5, kind: input, shape index: {}]   ;;  %s966_s6 = inlined_call_operand.vmem [shape: f32[1,128], index: 6, kind: input, shape index: {}]   ;;  %s967_s7 = inlined_call_operand.hbm [shape: f32[1,1,128], index: 7, kind: output, shape index: {}]  }
   0x1   :  { %v29_v0 = vld [vmem:[%s960_s0 + $0x8] sm:$0xff]  ;;  %v31_v1 = vld [vmem:[%s960_s0 + $0x18] sm:$0xff]  ;;  %v28_v2 = vld [vmem:[%s960_s0] sm:$0xff]  ;;  %106 = vmatprep.mubr.f32.mxu0 %v571_v7 }
   0x2   :  { %v439_v3 = vpack.c.bf16 %v31_v1, %v29_v0  ;;  %v30_v4 = vld [vmem:[%s960_s0 + $0x10] sm:$0xff]  ;;  %v33_v5 = vld [vmem:[%s960_s0 + $0x28] sm:$0xff]  ;;  %v35_v6 = vld [vmem:[%s960_s0 + $0x38] sm:$0xff] }
   0x3   :  { %v441_v8 = vpack.c.bf16 %v30_v4, %v28_v2  ;;  %v443_v9 = vpack.c.bf16 %v35_v6, %v33_v5  ;;  %v32_v10 = vld [vmem:[%s960_s0 + $0x20] sm:$0xff]  ;;  %v34_v11 = vld [vmem:[%s960_s0 + $0x30] sm:$0xff]  ;;  %v116_v12 = vld [vmem:[%s962_s2 + $0x8] sm:$0xff] }
   0x4   :  { %440 = vmatprep.subr.bf16.mxu0 %v439_v3  ;;  %v445_v13 = vpack.c.bf16 %v34_v11, %v32_v10  ;;  %v37_v14 = vld [vmem:[%s960_s0 + $0x48] sm:$0xff]  ;;  %v118_v15 = vld [vmem:[%s962_s2 + $0x18] sm:$0xff]  ;;  %v115_v16 = vld [vmem:[%s962_s2] sm:$0xff] }
   0x5   :  { %442 = vmatpush1.bf16.msra.mxu0 %v441_v8  ;;  %v117_v17 = vld [vmem:[%s962_s2 + $0x10] sm:$0xff]  ;;  %v447_v18 = vpack.c.bf16 %v118_v15, %v116_v12  ;;  %v120_v20 = vld [vmem:[%s962_s2 + $0x28] sm:$0xff]  ;;  %v122_v21 = vld [vmem:[%s962_s2 + $0x38] sm:$0xff] }
   0x6   :  { %444 = vmatprep.subr.bf16.mxu0 %v443_v9  ;;  %v449_v19 = vpack.c.bf16 %v117_v17, %v115_v16  ;;  %v119_v22 = vld [vmem:[%s962_s2 + $0x20] sm:$0xff]  ;;  %v451_v23 = vpack.c.bf16 %v122_v21, %v120_v20  ;;  %v121_v24 = vld [vmem:[%s962_s2 + $0x30] sm:$0xff]  ;;  %v124_v25 = vld [vmem:[%s962_s2 + $0x48] sm:$0xff] }
   0x7   :  { %v126_v26 = vld [vmem:[%s962_s2 + $0x58] sm:$0xff]  ;;  %448 = vmatprep.subr.bf16.mxu1 %v447_v18  ;;  %v453_v27 = vpack.c.bf16 %v121_v24, %v119_v22  ;;  %v36_v28 = vld [vmem:[%s960_s0 + $0x40] sm:$0xff]  ;;  %v125_v31 = vld [vmem:[%s962_s2 + $0x50] sm:$0xff] }
   0x8   :  { %450 = vmatpush1.bf16.msra.mxu1 %v449_v19  ;;  %v455_v29 = vpack.c.bf16 %v126_v26, %v124_v25  ;;  %v123_v30 = vld [vmem:[%s962_s2 + $0x40] sm:$0xff]  ;;  %v128_v33 = vld [vmem:[%s962_s2 + $0x68] sm:$0xff]  ;;  %v130_v34 = vld [vmem:[%s962_s2 + $0x78] sm:$0xff] }
   0x9   :  { %446 = vmatpush1.bf16.msra.mxu0 %v445_v13  ;;  %452 = vmatprep.subr.bf16.mxu1 %v451_v23  ;;  %v27_v32 = vld [vmem:[%s961_s1] sm:$0xff]  ;;  %v457_v35 = vpack.c.bf16 %v125_v31, %v123_v30  ;;  %v459_v36 = vpack.c.bf16 %v130_v34, %v128_v33  ;;  %v129_v38 = vld [vmem:[%s962_s2 + $0x70] sm:$0xff]  ;;  %v132_v39 = vld [vmem:[%s962_s2 + $0x88] sm:$0xff] }
   0xa   :  { %50 = vmatprep.subr.mxu0 %v37_v14  ;;  %v127_v37 = vld [vmem:[%s962_s2 + $0x60] sm:$0xff]  ;;  %v134_v40 = vld [vmem:[%s962_s2 + $0x98] sm:$0xff]  ;;  %v133_v44 = vld [vmem:[%s962_s2 + $0x90] sm:$0xff] }
   0xb   :  { %v461_v41 = vpack.c.bf16 %v129_v38, %v127_v37  ;;  %v463_v42 = vpack.c.bf16 %v134_v40, %v132_v39  ;;  %v131_v43 = vld [vmem:[%s962_s2 + $0x80] sm:$0xff]  ;;  %v136_v45 = vld [vmem:[%s962_s2 + $0xa8] sm:$0xff]  ;;  %v138_v46 = vld [vmem:[%s962_s2 + $0xb8] sm:$0xff] }
   0xc   :  { %454 = vmatpush1.bf16.msra.mxu1 %v453_v27  ;;  %v465_v47 = vpack.c.bf16 %v133_v44, %v131_v43  ;;  %v467_v48 = vpack.c.bf16 %v138_v46, %v136_v45  ;;  %v135_v49 = vld [vmem:[%s962_s2 + $0xa0] sm:$0xff]  ;;  %v137_v50 = vld [vmem:[%s962_s2 + $0xb0] sm:$0xff]  ;;  %v140_v51 = vld [vmem:[%s962_s2 + $0xc8] sm:$0xff] }
   0xd   :  { %51 = vmatpush1.msra.mxu0 %v36_v28  ;;  %456 = vmatprep.subr.bf16.mxu1 %v455_v29  ;;  %v142_v52 = vld [vmem:[%s962_s2 + $0xd8] sm:$0xff] }
   0xe   :  { %403 = vmatmul.mubr.msk.f32.vlgmr.msra.gmra.mrb[0].mxu0 %vm38_vm0, %v27_v32 }
  0x10   :  { %458 = vmatpush1.bf16.msra.mxu1 %v457_v35 }
  0x11   :  { %460 = vmatprep.subr.bf16.mxu1 %v459_v36 }
  0x14   :  { %462 = vmatpush1.bf16.msra.mxu1 %v461_v41 }
  0x15   :  { %464 = vmatprep.subr.bf16.mxu1 %v463_v42 }
  0x16   :  { %12 = vsyncpa [#allocation3], 0  ;;  %v469_v53 = vpack.c.bf16 %v137_v50, %v135_v49  ;;  %v471_v54 = vpack.c.bf16 %v142_v52, %v140_v51  ;;  %v139_v55 = vld [vmem:[%s962_s2 + $0xc0] sm:$0xff]  ;;  %v141_v56 = vld [vmem:[%s962_s2 + $0xd0] sm:$0xff]  ;;  %s572_s8 = smov 64   ;;  %s573_s17 = smov 32  }
  0x17   :  { %v144_v57 = vld [vmem:[%s962_s2 + $0xe8] sm:$0xff]  ;;  %v146_v58 = vld [vmem:[%s962_s2 + $0xf8] sm:$0xff]  ;;  %v473_v59 = vpack.c.bf16 %v141_v56, %v139_v55  ;;  %v143_v61 = vld [vmem:[%s962_s2 + $0xe0] sm:$0xff]  ;;  %s574_s21 = smov [#allocation2]  }
  0x18   :  { %466 = vmatpush1.bf16.msra.mxu1 %v465_v47  ;;  %v475_v60 = vpack.c.bf16 %v146_v58, %v144_v57  ;;  %v145_v62 = vld [vmem:[%s962_s2 + $0xf0] sm:$0xff]  ;;  %v148_v63 = vld [vmem:[%s962_s2 + $0x108] sm:$0xff]  ;;  %v150_v0 = vld [vmem:[%s962_s2 + $0x118] sm:$0xff]  ;;  %s395_s22 = sshll.u32 %s574_s21, 4  ;;  %s396_s22 = int_to_ptr.vmem [resolvable:$true] %s395_s22 }
  0x19   :  { %468 = vmatprep.subr.bf16.mxu1 %v467_v48  ;;  %v477_v1 = vpack.c.bf16 %v145_v62, %v143_v61  ;;  %v479_v2 = vpack.c.bf16 %v150_v0, %v148_v63  ;;  %v147_v3 = vld [vmem:[%s962_s2 + $0x100] sm:$0xff]  ;;  %v149_v4 = vld [vmem:[%s962_s2 + $0x110] sm:$0xff]  ;;  %v152_v5 = vld [vmem:[%s962_s2 + $0x128] sm:$0xff]  ;;  %s551_s23 = scalar_lea.vmem %s396_s22, 32  ;;  %p552_p1 = scmp.lt.s32.totalorder %s396_s22, %s396_s22 }
  0x1a   :  { %v154_v6 = vld [vmem:[%s962_s2 + $0x138] sm:$0xff]  ;;  %v481_v7 = vpack.c.bf16 %v149_v4, %v147_v3  ;;  %v151_v9 = vld [vmem:[%s962_s2 + $0x120] sm:$0xff]  ;;  %v153_v10 = vld [vmem:[%s962_s2 + $0x130] sm:$0xff] }
  0x1b   :  { %v483_v8 = vpack.c.bf16 %v154_v6, %v152_v5  ;;  %v156_v11 = vld [vmem:[%s962_s2 + $0x148] sm:$0xff]  ;;  %v158_v12 = vld [vmem:[%s962_s2 + $0x158] sm:$0xff]  ;;  %v485_v13 = vpack.c.bf16 %v153_v10, %v151_v9  ;;  %v155_v15 = vld [vmem:[%s962_s2 + $0x140] sm:$0xff] }
  0x1c   :  { %470 = vmatpush1.bf16.msra.mxu1 %v469_v53  ;;  %v487_v14 = vpack.c.bf16 %v158_v12, %v156_v11  ;;  %v157_v16 = vld [vmem:[%s962_s2 + $0x150] sm:$0xff]  ;;  %v160_v17 = vld [vmem:[%s962_s2 + $0x168] sm:$0xff]  ;;  %v162_v18 = vld [vmem:[%s962_s2 + $0x178] sm:$0xff] }
  0x1d   :  { %472 = vmatprep.subr.bf16.mxu1 %v471_v54  ;;  %v489_v19 = vpack.c.bf16 %v157_v16, %v155_v15  ;;  %v491_v20 = vpack.c.bf16 %v162_v18, %v160_v17  ;;  %v159_v21 = vld [vmem:[%s962_s2 + $0x160] sm:$0xff]  ;;  %v161_v22 = vld [vmem:[%s962_s2 + $0x170] sm:$0xff]  ;;  %v164_v23 = vld [vmem:[%s962_s2 + $0x188] sm:$0xff] }
  0x1e   :  { %v166_v24 = vld [vmem:[%s962_s2 + $0x198] sm:$0xff]  ;;  %v493_v25 = vpack.c.bf16 %v161_v22, %v159_v21  ;;  %v163_v27 = vld [vmem:[%s962_s2 + $0x180] sm:$0xff]  ;;  %v165_v28 = vld [vmem:[%s962_s2 + $0x190] sm:$0xff] }
  0x1f   :  { %v495_v26 = vpack.c.bf16 %v166_v24, %v164_v23  ;;  %v168_v29 = vld [vmem:[%s962_s2 + $0x1a8] sm:$0xff]  ;;  %v170_v30 = vld [vmem:[%s962_s2 + $0x1b8] sm:$0xff]  ;;  %v497_v31 = vpack.c.bf16 %v165_v28, %v163_v27  ;;  %v167_v33 = vld [vmem:[%s962_s2 + $0x1a0] sm:$0xff] }
  0x20   :  { %474 = vmatpush1.bf16.msra.mxu1 %v473_v59  ;;  %v499_v32 = vpack.c.bf16 %v170_v30, %v168_v29  ;;  %v169_v34 = vld [vmem:[%s962_s2 + $0x1b0] sm:$0xff]  ;;  %v172_v35 = vld [vmem:[%s962_s2 + $0x1c8] sm:$0xff]  ;;  %v174_v36 = vld [vmem:[%s962_s2 + $0x1d8] sm:$0xff] }
  0x21   :  { %476 = vmatprep.subr.bf16.mxu1 %v475_v60  ;;  %v501_v37 = vpack.c.bf16 %v169_v34, %v167_v33  ;;  %v503_v38 = vpack.c.bf16 %v174_v36, %v172_v35  ;;  %v171_v39 = vld [vmem:[%s962_s2 + $0x1c0] sm:$0xff]  ;;  %v173_v40 = vld [vmem:[%s962_s2 + $0x1d0] sm:$0xff]  ;;  %v176_v42 = vld [vmem:[%s962_s2 + $0x1e8] sm:$0xff] }
  0x22   :  { %v505_v41 = vpack.c.bf16 %v173_v40, %v171_v39  ;;  %v178_v43 = vld [vmem:[%s962_s2 + $0x1f8] sm:$0xff]  ;;  %v175_v45 = vld [vmem:[%s962_s2 + $0x1e0] sm:$0xff]  ;;  %v177_v46 = vld [vmem:[%s962_s2 + $0x1f0] sm:$0xff] }
  0x23   :  { %v507_v44 = vpack.c.bf16 %v178_v43, %v176_v42  ;;  %v509_v47 = vpack.c.bf16 %v177_v46, %v175_v45  ;;  %v301_v52 = vld [vmem:[%s965_s5 + $0x80] sm:$0xff]  ;;  %v302_v53 = vld [vmem:[%s965_s5 + $0x88] sm:$0xff]  ;;  %v303_v57 = vld [vmem:[%s965_s5 + $0x90] sm:$0xff]  ;;  %v271_v45 = vlaneseq }
  0x24   :  { %478 = vmatpush1.bf16.msra.mxu1 %v477_v1  ;;  %v285_v54 = vld [vmem:[%s965_s5] sm:$0xff]  ;;  %v511_v55 = vpack.c.bf16 %v302_v53, %v301_v52  ;;  %v286_v56 = vld [vmem:[%s965_s5 + $0x8] sm:$0xff]  ;;  %v304_v58 = vld [vmem:[%s965_s5 + $0x98] sm:$0xff] }
  0x25   :  { %480 = vmatprep.subr.bf16.mxu1 %v479_v2  ;;  %v513_v59 = vpack.c.bf16 %v286_v56, %v285_v54  ;;  %v515_v60 = vpack.c.bf16 %v304_v58, %v303_v57  ;;  %v287_v61 = vld [vmem:[%s965_s5 + $0x10] sm:$0xff]  ;;  %v288_v62 = vld [vmem:[%s965_s5 + $0x18] sm:$0xff]  ;;  %v305_v63 = vld [vmem:[%s965_s5 + $0xa0] sm:$0xff] }
  0x26   :  { %v250_v0 = vld [vmem:[%s963_s3] sm:$0xff]  ;;  %512 = vmatprep.subr.bf16.mxu0 %v511_v55  ;;  %v306_v1 = vld [vmem:[%s965_s5 + $0xa8] sm:$0xff]  ;;  %v517_v3 = vpack.c.bf16 %v288_v62, %v287_v61  ;;  %v307_v10 = vld [vmem:[%s965_s5 + $0xb0] sm:$0xff] }
  0x27   :  { %v251_v2 = vld [vmem:[%s963_s3 + $0x8] sm:$0xff]  ;;  %514 = vmatpush3.bf16.msra.mxu0 %v513_v59  ;;  %v519_v5 = vpack.c.bf16 %v306_v1, %v305_v63  ;;  %v289_v6 = vld [vmem:[%s965_s5 + $0x20] sm:$0xff]  ;;  %v308_v11 = vld [vmem:[%s965_s5 + $0xb8] sm:$0xff] }
  0x28   :  { %482 = vmatpush1.bf16.msra.mxu1 %v481_v7  ;;  %516 = vmatprep.subr.bf16.mxu0 %v515_v60  ;;  %v290_v7 = vld [vmem:[%s965_s5 + $0x28] sm:$0xff]  ;;  %v523_v15 = vpack.c.bf16 %v308_v11, %v307_v10  ;;  %v291_v16 = vld [vmem:[%s965_s5 + $0x30] sm:$0xff]  ;;  %v292_v17 = vld [vmem:[%s965_s5 + $0x38] sm:$0xff] }
  0x29   :  { %484 = vmatprep.subr.bf16.mxu1 %v483_v8  ;;  %v525_v18 = vpack.c.bf16 %v292_v17, %v291_v16  ;;  %v293_v22 = vld [vmem:[%s965_s5 + $0x40] sm:$0xff]  ;;  %v294_v23 = vld [vmem:[%s965_s5 + $0x48] sm:$0xff]  ;;  %v295_v28 = vld [vmem:[%s965_s5 + $0x50] sm:$0xff] }
  0x2a   :  { %v529_v24 = vpack.c.bf16 %v294_v23, %v293_v22  ;;  %v296_v29 = vld [vmem:[%s965_s5 + $0x58] sm:$0xff]  ;;  %v297_v34 = vld [vmem:[%s965_s5 + $0x60] sm:$0xff]  ;;  %v298_v35 = vld [vmem:[%s965_s5 + $0x68] sm:$0xff] }
  0x2b   :  { %518 = vmatpush3.bf16.msra.mxu0 %v517_v3  ;;  %v533_v30 = vpack.c.bf16 %v296_v29, %v295_v28  ;;  %v316_v39 = vld [vmem:[%s965_s5 + $0xf8] sm:$0xff]  ;;  %v299_v40 = vld [vmem:[%s965_s5 + $0x70] sm:$0xff]  ;;  %v269_v54 = vld [vmem:[%s964_s4] sm:$0x3]  ;;  %s547_s4 = scalar_lea.vmem %s396_s22, 16 }
  0x2c   :  { %486 = vmatpush1.bf16.msra.mxu1 %v485_v13  ;;  %v521_v13 = vpack.c.bf16 %v290_v7, %v289_v6  ;;  %520 = vmatprep.subr.bf16.mxu0 %v519_v5  ;;  %v300_v43 = vld [vmem:[%s965_s5 + $0x78] sm:$0xff]  ;;  %p548_p0 = scmp.ne.s32.totalorder %s396_s22, %s547_s4  ;;  %p553_p2 = scmp.lt.s32.totalorder %s551_s23, %s547_s4 }
  0x2d   :  { %488 = vmatprep.subr.bf16.mxu1 %v487_v14 }
  0x2e   :  { %p554_p3 = por %p553_p2, %p552_p1 }
  0x2f   :  { %522 = vmatpush3.bf16.msra.mxu0 %v521_v13 }
  0x30   :  { %490 = vmatpush1.bf16.msra.mxu1 %v489_v19  ;;  %524 = vmatprep.subr.bf16.mxu0 %v523_v15  ;;  %v309_v19 = vld [vmem:[%s965_s5 + $0xc0] sm:$0xff]  ;;  %p555_p4 = pnand %p554_p3, %p548_p0 }
  0x31   :  { %492 = vmatprep.subr.bf16.mxu1 %v491_v20  ;;  %v310_v20 = vld [vmem:[%s965_s5 + $0xc8] sm:$0xff] }
  0x32   :  { %v527_v21 = vpack.c.bf16 %v310_v20, %v309_v19 }
  0x33   :  { %526 = vmatpush3.bf16.msra.mxu0 %v525_v18 }
  0x34   :  { %494 = vmatpush1.bf16.msra.mxu1 %v493_v25  ;;  %528 = vmatprep.subr.bf16.mxu0 %v527_v21  ;;  %v311_v25 = vld [vmem:[%s965_s5 + $0xd0] sm:$0xff] }
  0x35   :  { %496 = vmatprep.subr.bf16.mxu1 %v495_v26  ;;  %v312_v26 = vld [vmem:[%s965_s5 + $0xd8] sm:$0xff] }
  0x36   :  { %v531_v27 = vpack.c.bf16 %v312_v26, %v311_v25 }
  0x37   :  { %530 = vmatpush3.bf16.msra.mxu0 %v529_v24 }
  0x38   :  { %498 = vmatpush1.bf16.msra.mxu1 %v497_v31  ;;  %532 = vmatprep.subr.bf16.mxu0 %v531_v27  ;;  %v313_v31 = vld [vmem:[%s965_s5 + $0xe0] sm:$0xff] }
  0x39   :  { %500 = vmatprep.subr.bf16.mxu1 %v499_v32  ;;  %v314_v32 = vld [vmem:[%s965_s5 + $0xe8] sm:$0xff] }
  0x3a   :  { %v535_v33 = vpack.c.bf16 %v314_v32, %v313_v31 }
  0x3b   :  { %534 = vmatpush3.bf16.msra.mxu0 %v533_v30 }
  0x3c   :  { %502 = vmatpush1.bf16.msra.mxu1 %v501_v37  ;;  %v537_v37 = vpack.c.bf16 %v298_v35, %v297_v34  ;;  %536 = vmatprep.subr.bf16.mxu0 %v535_v33 }
  0x3d   :  { %504 = vmatprep.subr.bf16.mxu1 %v503_v38  ;;  %v315_v38 = vld [vmem:[%s965_s5 + $0xf0] sm:$0xff] }
  0x3e   :  { %v539_v42 = vpack.c.bf16 %v316_v39, %v315_v38 }
  0x3f   :  { %538 = vmatpush3.bf16.msra.mxu0 %v537_v37 }
  0x40   :  { %506 = vmatpush1.bf16.msra.mxu1 %v505_v41  ;;  %540 = vmatprep.subr.bf16.mxu0 %v539_v42 }
  0x41   :  { %508 = vmatprep.subr.bf16.mxu1 %v507_v44  ;;  %v541_v44 = vpack.c.bf16 %v300_v43, %v299_v40 }
  0x43   :  { %542 = vmatpush3.bf16.msra.mxu0 %v541_v44 }
  0x44   :  { %510 = vmatpush1.bf16.msra.mxu1 %v509_v47 }
  0xe1   :  { %v108_v48 = vpop.f32.mrb[0].mxu0 }
  0xe2   :  { %v110_v49 = vpop.f32.mrb[1].mxu0  ;;  %v113_v51 = vmax.f32 %v108_v48, 0.0 }
  0xe3   :  { %v114_v50 = vmax.f32 %v110_v49, 0.0  ;;  %v272_v49 = vshrl.u32 %v271_v45, 7 }
  0xe5   :  { %243 = vmatprep.mubr.f32.mxu1 %v114_v50  ;;  %v273_v52 = vsub.s32 0, %v272_v49  ;;  %v277_v53 = vsub.s32 1, %v272_v49 }
  0xe6   :  { %244 = vmatmul.mubr.f32.vlgmr.msra.gmra.mrb[0].mxu1 %v113_v51 }
  0xe7   :  { %v274_v57 = vrot.slane %v269_v54, %v273_v52  ;;  %v278_v58 = vrot.slane %v269_v54, %v277_v53 }
 0x1b9   :  { %v245_v4 = vpop.f32.mrb[0].mxu1 }
 0x1ba   :  { %v252_v8 = vmul.f32 %v250_v0, %v245_v4  ;;  %v247_v9 = vpop.f32.mrb[1].mxu1 }
 0x1bb   :  { %v253_v12 = vmul.f32 %v251_v2, %v247_v9  ;;  %v317_v2 = vld [vmem:[%s966_s6] sm:$0x1] }
 0x1bd   :  { %v254_v14 = vadd.f32 %v253_v12, %v252_v8 }
 0x1bf   :  { %255 = vrot.lane.b32.xlu0 %v254_v14, %s572_s8 }
 0x231   :  { %v256_v36 = vpop.permute.xlu0 %255 }
 0x232   :  { %v259_v41 = vadd.f32 %v256_v36, %v254_v14 }
 0x234   :  { %260 = vrot.lane.b32.xlu0 %v259_v41, %s573_s17 }
 0x2a6   :  { %v261_v46 = vpop.permute.xlu0 %260 }
 0x2a7   :  { %v262_v47 = vadd.f32 %v261_v46, %v259_v41 }
 0x2a9   :  { %v263_v48 = vrot.slane %v262_v47, 4 }
 0x2ab   :  { %v264_v50 = vadd.f32 %v263_v48, %v262_v47 }
 0x2ad   :  { %v265_v51 = vrot.slane %v264_v50, 2 }
 0x2af   :  { %v266_v55 = vadd.f32 %v265_v51, %v264_v50 }
 0x2b1   :  { %v267_v56 = vrot.slane %v266_v55, 1 }
 0x2b3   :  { %v268_v59 = vadd.f32 %v267_v56, %v266_v55 }
 0x2b5   :  { %v282_v60 = vadd.f32 %v278_v58, %v268_v59  ;;  %v281_v61 = vadd.f32 %v274_v57, %v268_v59 }
 0x2b7   :  { %v284_v62 = vmax.f32 %v282_v60, 0.0  ;;  %v283_v63 = vmax.f32 %v281_v61, 0.0 }
 0x2b9   :  { %382 = vmatprep.mubr.f32.mxu0 %v284_v62 }
 0x2ba   :  { %383 = vmatmul.mubr.f32.vlgmr.msra.gmra.mrb[2].mxu0 %v283_v63 }
 0x38d   :  { %v436_v0 = vpop.f32.mrb[2].mxu0 }
 0x38e   :  { %v437_v1 = vpop.f32.mrb[3].mxu0 }
 0x38f   :  { %v438_v3 = vadd.f32 %v437_v1, %v436_v0 }
 0x391   :  { %v385_v4 = vadd.f32 %v438_v3, %v317_v2 }
 0x393   :  { %388 = vst [vmem:[#allocation2] sm:$0x1] %v385_v4 }
 0x394   :  { %558 = shalt.err (!%p555_p4)
}
 0x395   :  { %s559_s0 = scalar_lea.hbm %s967_s7, 16 }
 0x396   :  { %p560_p5 = scmp.ne.s32.totalorder %s967_s7, %s559_s0  ;;  %p563_p6 = scmp.lt.u32.totalorder %s559_s0, %s967_s7 }
 0x398   :  { %p565_p7 = pnand %p563_p6, %p560_p5 }
 0x39a   :  { %568 = shalt.err (!%p565_p7)
}
 0x39b   :  { %398 = dma.vmem_to_hbm [thread:$0]  %s396_s22, 16, %s967_s7, [#allocation3]  }
 0x39c   :  { %569 = dma.done.wait [#allocation3], 16  }
 0x39d   :  { %570 = vsyncadd [#allocation3], 4294967280 }
 0x39e   :  { %402 = vsyncpa [#allocation3], 1 }

</bundles_post_ra>
